<compile_context>
chip_gen: v7x
topology: tpu7x:2x2x1
jax: 0.10.0
libtpu: 0.0.40
codegen_flags: <defaults>
</compile_context>

<pallas_src>
import functools

import jax
import jax.numpy as jnp
from jax import lax
from jax.experimental import pallas as pl
from jax.experimental.pallas import tpu as pltpu

# ----------------------------- config (small) -----------------------------
HIDDEN = 32
INTERMEDIATE = 64
NUM_LAYERS = 2
NUM_HEADS = 4
HEAD_DIM = HIDDEN // NUM_HEADS
LAYER_NORM_EPS = 1e-6
BATCH = 2
SEQ = 8

# packed vector-parameter slab rows (lane width = round_up(max(3D, I), 128)):
# 0 ln1_w | 1 ln1_b | 2 bqkv(3D) | 3 bo | 4 ln2_w | 5 ln2_b | 6 b1(I) | 7 b2
VEC_ROWS = 8


def _round_up(n, m):
    return (n + m - 1) // m * m


def _layer_norm(x, w, b, eps):
    # two-pass (biased) variance — matches torch.nn.LayerNorm, avoids the
    # catastrophic cancellation of E[x^2] - mu^2.
    mu = jnp.mean(x, axis=-1, keepdims=True)
    d = x - mu
    var = jnp.mean(d * d, axis=-1, keepdims=True)
    return d * lax.rsqrt(var + eps) * w + b


def siglip_encoder_kernel(
    x_ref, wqkv_ref, wo_ref, w1_ref, w2_ref, vec_ref,   # inputs
    out_ref,                                            # output == hidden-state carry
    *, num_heads, head_dim, hidden, inter, eps,
):
    layer = pl.program_id(1)

    # layer 0 of this batch tile: load the input into the resident carry.
    @pl.when(layer == 0)
    def _():
        out_ref[...] = x_ref[...]

    x = out_ref[...]                 # (S, D) f32, VMEM-resident across layers
    vec = vec_ref[0]                 # (8, PAD) packed LN weights + biases, f32

    ln1_w = vec[0:1, :hidden]
    ln1_b = vec[1:2, :hidden]
    bqkv = vec[2:3, :3 * hidden]
    bo = vec[3:4, :hidden]
    ln2_w = vec[4:5, :hidden]
    ln2_b = vec[5:6, :hidden]
    b1 = vec[6:7, :inter]
    b2 = vec[7:8, :hidden]

    # ---- LayerNorm 1 + fused QKV projection (one bf16 matmul, f32 accum) ----
    h = _layer_norm(x, ln1_w, ln1_b, eps)
    qkv = jnp.dot(h.astype(jnp.bfloat16), wqkv_ref[0],
                  preferred_element_type=jnp.float32) + bqkv      # (S, 3D) f32

    # ---- multi-head self-attention, out_proj fused per head ----
    scale = head_dim ** (-0.5)
    dn = (((1,), (1,)), ((), ()))    # contract last dims: q @ k^T, no transpose
    attn = jnp.zeros_like(x)
    for hh in range(num_heads):      # static unroll over H=4 heads (small)
        c0 = hh * head_dim
        q_h = qkv[:, c0:c0 + head_dim]
        k_h = qkv[:, hidden + c0:hidden + c0 + head_dim]
        v_h = qkv[:, 2 * hidden + c0:2 * hidden + c0 + head_dim]
        s = lax.dot_general(q_h.astype(jnp.bfloat16), k_h.astype(jnp.bfloat16),
                            dn, preferred_element_type=jnp.float32) * scale
        s = s - jnp.max(s, axis=-1, keepdims=True)
        p = jnp.exp(s)
        p = p / jnp.sum(p, axis=-1, keepdims=True)                # exact softmax, f32
        o_h = jnp.dot(p.astype(jnp.bfloat16), v_h.astype(jnp.bfloat16),
                      preferred_element_type=jnp.float32)         # (S, hd) f32
        # fused output projection: accumulate head_h @ Wo[h]  (contiguous tile)
        attn = attn + jnp.dot(o_h.astype(jnp.bfloat16), wo_ref[0, hh],
                              preferred_element_type=jnp.float32)
    x = x + attn + bo                # residual 1 (bias added once)

    # ---- LayerNorm 2 + MLP (gelu tanh), bf16 matmuls / f32 elementwise ----
    h2 = _layer_norm(x, ln2_w, ln2_b, eps)
    m = jnp.dot(h2.astype(jnp.bfloat16), w1_ref[0],
                preferred_element_type=jnp.float32) + b1
    m = jax.nn.gelu(m, approximate=True)          # tanh approximation (matches torch)
    m = jnp.dot(m.astype(jnp.bfloat16), w2_ref[0],
                preferred_element_type=jnp.float32) + b2
    x = x + m                        # residual 2

    out_ref[...] = x                 # carry to next layer (stays in VMEM; HBM
                                     # writeback only when the batch tile changes)


def siglip_encoder(x, packed, *, num_heads=NUM_HEADS, eps=LAYER_NORM_EPS):
    """Full SiglipEncoder forward in one pallas_call.  x: (B, S, D) f32."""
    B, S, D = x.shape
    L = packed["wqkv"].shape[0]
    I = packed["w1"].shape[2]
    head_dim = D // num_heads
    vec_pad = packed["vec"].shape[2]
    BS = B * S
    x2 = x.reshape(BS, D)

    kernel = functools.partial(
        siglip_encoder_kernel,
        num_heads=num_heads, head_dim=head_dim, hidden=D, inter=I, eps=eps)

    out2 = pl.pallas_call(
        kernel,
        out_shape=jax.ShapeDtypeStruct((BS, D), jnp.float32),
        grid_spec=pltpu.PrefetchScalarGridSpec(
            num_scalar_prefetch=0,
            grid=(B, L),                                   # (parallel batch, sequential layers)
            in_specs=[
                pl.BlockSpec((S, D), lambda b, l: (b, 0)),                 # x, fetched once per b
                pl.BlockSpec((1, D, 3 * D), lambda b, l: (l, 0, 0)),       # fused wq|wk|wv (bf16)
                pl.BlockSpec((1, num_heads, head_dim, D),
                             lambda b, l: (l, 0, 0, 0)),                   # out_proj, per-head tiles
                pl.BlockSpec((1, D, I), lambda b, l: (l, 0, 0)),           # fc1 weight (bf16)
                pl.BlockSpec((1, I, D), lambda b, l: (l, 0, 0)),           # fc2 weight (bf16)
                pl.BlockSpec((1, VEC_ROWS, vec_pad), lambda b, l: (l, 0, 0)),  # LN params + biases
            ],
            # constant index across the layer axis -> VMEM-resident carry
            out_specs=pl.BlockSpec((S, D), lambda b, l: (b, 0)),
        ),
        compiler_params=pltpu.CompilerParams(
            dimension_semantics=("parallel", "arbitrary"),
        ),
    )(x2, packed["wqkv"], packed["wo"], packed["w1"], packed["w2"], packed["vec"])
    return out2.reshape(B, S, D)


# ----------------------------- parameter setup -----------------------------
def init_layer_params(key, hidden, inter):
    std = 0.02
    ks = jax.random.split(key, 12)

    def w(k, fi, fo):  # stored pre-transposed as (in, out): x @ W + b == torch x @ W.T + b
        return std * jax.random.normal(k, (fi, fo), jnp.float32)

    def bvec(k, n):
        return std * jax.random.normal(k, (n,), jnp.float32)

    return dict(
        ln1_w=jnp.ones((hidden,), jnp.float32), ln1_b=jnp.zeros((hidden,), jnp.float32),
        wq=w(ks[0], hidden, hidden), bq=bvec(ks[1], hidden),
        wk=w(ks[2], hidden, hidden), bk=bvec(ks[3], hidden),
        wv=w(ks[4], hidden, hidden), bv=bvec(ks[5], hidden),
        wo=w(ks[6], hidden, hidden), bo=bvec(ks[7], hidden),
        ln2_w=jnp.ones((hidden,), jnp.float32), ln2_b=jnp.zeros((hidden,), jnp.float32),
        w1=w(ks[8], hidden, inter), b1=bvec(ks[9], inter),
        w2=w(ks[10], inter, hidden), b2=bvec(ks[11], hidden),
    )


def pack_params(layers, hidden, inter, num_heads):
    head_dim = hidden // num_heads
    wqkv = jnp.stack(
        [jnp.concatenate([p["wq"], p["wk"], p["wv"]], axis=1) for p in layers]
    ).astype(jnp.bfloat16)
    # out_proj stored as (H, head_dim, D):  attn_out @ Wo == sum_h head_h @ Wo[h]
    wo = jnp.stack(
        [p["wo"].reshape(num_heads, head_dim, hidden) for p in layers]
    ).astype(jnp.bfloat16)
    w1 = jnp.stack([p["w1"] for p in layers]).astype(jnp.bfloat16)
    w2 = jnp.stack([p["w2"] for p in layers]).astype(jnp.bfloat16)

    pad = _round_up(max(3 * hidden, inter, hidden), 128)
    vecs = []
    for p in layers:
        v = jnp.zeros((VEC_ROWS, pad), jnp.float32)
        v = v.at[0, :hidden].set(p["ln1_w"])
        v = v.at[1, :hidden].set(p["ln1_b"])
        v = v.at[2, :3 * hidden].set(jnp.concatenate([p["bq"], p["bk"], p["bv"]]))
        v = v.at[3, :hidden].set(p["bo"])
        v = v.at[4, :hidden].set(p["ln2_w"])
        v = v.at[5, :hidden].set(p["ln2_b"])
        v = v.at[6, :inter].set(p["b1"])
        v = v.at[7, :hidden].set(p["b2"])
        vecs.append(v)
    return dict(wqkv=wqkv, wo=wo, w1=w1, w2=w2, vec=jnp.stack(vecs))


# ----------------------------- pure-JAX reference -----------------------------
def ref_encoder(x, layers, num_heads, eps):
    B, S, D = x.shape
    hd = D // num_heads
    scale = hd ** (-0.5)

    def ln(v, w, b):
        mu = jnp.mean(v, axis=-1, keepdims=True)
        var = jnp.mean((v - mu) ** 2, axis=-1, keepdims=True)
        return (v - mu) * lax.rsqrt(var + eps) * w + b

    for p in layers:
        h = ln(x, p["ln1_w"], p["ln1_b"])
        q = h @ p["wq"] + p["bq"]
        k = h @ p["wk"] + p["bk"]
        v = h @ p["wv"] + p["bv"]
        qh = q.reshape(B, S, num_heads, hd).transpose(0, 2, 1, 3)
        kh = k.reshape(B, S, num_heads, hd).transpose(0, 2, 1, 3)
        vh = v.reshape(B, S, num_heads, hd).transpose(0, 2, 1, 3)
        s = jnp.einsum("bhqd,bhkd->bhqk", qh, kh) * scale
        pm = jax.nn.softmax(s, axis=-1)
        o = jnp.einsum("bhqk,bhkd->bhqd", pm, vh)
        o = o.transpose(0, 2, 1, 3).reshape(B, S, D)
        x = x + (o @ p["wo"] + p["bo"])
        h2 = ln(x, p["ln2_w"], p["ln2_b"])
        m = jax.nn.gelu(h2 @ p["w1"] + p["b1"], approximate=True)
        x = x + (m @ p["w2"] + p["b2"])
    return x


if __name__ == "__main__":
    root = jax.random.PRNGKey(0)
    k_x, k_p = jax.random.split(root)

    x = jax.random.normal(k_x, (BATCH, SEQ, HIDDEN), jnp.float32)
    layer_keys = jax.random.split(k_p, NUM_LAYERS)
    layers = [init_layer_params(k, HIDDEN, INTERMEDIATE) for k in layer_keys]
    packed = pack_params(layers, HIDDEN, INTERMEDIATE, NUM_HEADS)

    out = siglip_encoder(x, packed)
    out = jax.block_until_ready(out)

    assert out.shape == (BATCH, SEQ, HIDDEN)
    assert jnp.all(jnp.isfinite(out))

    # numerical check against the pure-f32 JAX reference; the tolerance covers
    # the bf16 matmul operands (softmax/LayerNorm/gelu stay in exact f32).
    ref = ref_encoder(x, layers, NUM_HEADS, LAYER_NORM_EPS)
    err = float(jnp.max(jnp.abs(out - ref)))
    assert err < 2e-2, f"max abs err {err}"
    print("KERNEL_OK")
</pallas_src>

<mosaic_0001>
module attributes {stable_mosaic.version = 11 : i64} {
  func.func @siglip_encoder_kernel(%arg0: i32, %arg1: i32, %arg2: memref<8x32xf32, #tpu.memory_space<vmem>>, %arg3: memref<1x32x96xbf16, #tpu.memory_space<vmem>>, %arg4: memref<1x4x8x32xbf16, #tpu.memory_space<vmem>>, %arg5: memref<1x32x64xbf16, #tpu.memory_space<vmem>>, %arg6: memref<1x64x32xbf16, #tpu.memory_space<vmem>>, %arg7: memref<1x8x128xf32, #tpu.memory_space<vmem>>, %arg8: memref<8x32xf32, #tpu.memory_space<vmem>>) attributes {dimension_semantics = [#tpu.dimension_semantics<parallel>, #tpu.dimension_semantics<arbitrary>], iteration_bounds = array<i64: 2, 2>, scalar_prefetch = 0 : i64, scratch_operands = 0 : i64, tpu.core_type = #tpu.core_type<tc>, window_params = [{transform_indices = @transform_0, window_bounds = array<i64: 8, 32>}, {transform_indices = @transform_1, window_bounds = array<i64: 1, 32, 96>}, {transform_indices = @transform_2, window_bounds = array<i64: 1, 4, 8, 32>}, {transform_indices = @transform_3, window_bounds = array<i64: 1, 32, 64>}, {transform_indices = @transform_4, window_bounds = array<i64: 1, 64, 32>}, {transform_indices = @transform_5, window_bounds = array<i64: 1, 8, 128>}, {transform_indices = @transform_6, window_bounds = array<i64: 8, 32>}]} {
    %c0_i32 = arith.constant 0 : i32
    %0 = arith.cmpi eq, %arg1, %c0_i32 : i32
    %1 = arith.extui %0 : i1 to i32
    %c0_i32_0 = arith.constant 0 : i32
    %2 = arith.cmpi ne, %1, %c0_i32_0 : i32
    scf.if %2 {
      %c0_70 = arith.constant 0 : index
      %c0_71 = arith.constant 0 : index
      %191 = vector.load %arg2[%c0_70, %c0_71] : memref<8x32xf32, #tpu.memory_space<vmem>>, vector<8x32xf32>
      %c0_72 = arith.constant 0 : index
      %c0_73 = arith.constant 0 : index
      %192 = vector.load %arg8[%c0_72, %c0_73] : memref<8x32xf32, #tpu.memory_space<vmem>>, vector<8x32xf32>
      tpu.vector_store %arg8[%c0_72, %c0_73], %191 {strides = array<i32>} : memref<8x32xf32, #tpu.memory_space<vmem>>, vector<8x32xf32>,
    } else {
    }
    %c0 = arith.constant 0 : index
    %c0_1 = arith.constant 0 : index
    %3 = vector.load %arg8[%c0, %c0_1] : memref<8x32xf32, #tpu.memory_space<vmem>>, vector<8x32xf32>
    %c0_2 = arith.constant 0 : index
    %c0_3 = arith.constant 0 : index
    %c0_4 = arith.constant 0 : index
    %4 = vector.load %arg7[%c0_2, %c0_3, %c0_4] : memref<1x8x128xf32, #tpu.memory_space<vmem>>, vector<1x8x128xf32>
    %5 = vector.shape_cast %4 : vector<1x8x128xf32> to vector<8x128xf32>
    %6 = vector.extract_strided_slice %5 {offsets = [0, 0], sizes = [1, 32], strides = [1, 1]} : vector<8x128xf32> to vector<1x32xf32>
    %7 = vector.extract_strided_slice %5 {offsets = [1, 0], sizes = [1, 32], strides = [1, 1]} : vector<8x128xf32> to vector<1x32xf32>
    %8 = vector.extract_strided_slice %5 {offsets = [2, 0], sizes = [1, 96], strides = [1, 1]} : vector<8x128xf32> to vector<1x96xf32>
    %9 = vector.extract_strided_slice %5 {offsets = [3, 0], sizes = [1, 32], strides = [1, 1]} : vector<8x128xf32> to vector<1x32xf32>
    %10 = vector.extract_strided_slice %5 {offsets = [4, 0], sizes = [1, 32], strides = [1, 1]} : vector<8x128xf32> to vector<1x32xf32>
    %11 = vector.extract_strided_slice %5 {offsets = [5, 0], sizes = [1, 32], strides = [1, 1]} : vector<8x128xf32> to vector<1x32xf32>
    %12 = vector.extract_strided_slice %5 {offsets = [6, 0], sizes = [1, 64], strides = [1, 1]} : vector<8x128xf32> to vector<1x64xf32>
    %13 = vector.extract_strided_slice %5 {offsets = [7, 0], sizes = [1, 32], strides = [1, 1]} : vector<8x128xf32> to vector<1x32xf32>
    %cst = arith.constant dense<0.000000e+00> : vector<8xf32>
    %14 = vector.multi_reduction <add>, %3, %cst [1] : vector<8x32xf32> to vector<8xf32>
    %15 = vector.shape_cast %14 : vector<8xf32> to vector<8x1xf32>
    %cst_5 = arith.constant 3.200000e+01 : f32
    %16 = vector.broadcast %cst_5 : f32 to vector<8x1xf32>
    %17 = arith.divf %15, %16 : vector<8x1xf32>
    %18 = vector.broadcast %17 : vector<8x1xf32> to vector<8x32xf32>
    %19 = arith.subf %3, %18 : vector<8x32xf32>
    %20 = arith.mulf %19, %19 : vector<8x32xf32>
    %cst_6 = arith.constant dense<0.000000e+00> : vector<8xf32>
    %21 = vector.multi_reduction <add>, %20, %cst_6 [1] : vector<8x32xf32> to vector<8xf32>
    %22 = vector.shape_cast %21 : vector<8xf32> to vector<8x1xf32>
    %cst_7 = arith.constant 3.200000e+01 : f32
    %23 = vector.broadcast %cst_7 : f32 to vector<8x1xf32>
    %24 = arith.divf %22, %23 : vector<8x1xf32>
    %cst_8 = arith.constant 9.99999997E-7 : f32
    %25 = vector.broadcast %cst_8 : f32 to vector<8x1xf32>
    %26 = arith.addf %24, %25 : vector<8x1xf32>
    %27 = math.rsqrt %26 : vector<8x1xf32>
    %28 = vector.broadcast %27 : vector<8x1xf32> to vector<8x32xf32>
    %29 = arith.mulf %19, %28 : vector<8x32xf32>
    %30 = vector.broadcast %6 : vector<1x32xf32> to vector<8x32xf32>
    %31 = arith.mulf %29, %30 : vector<8x32xf32>
    %32 = vector.broadcast %7 : vector<1x32xf32> to vector<8x32xf32>
    %33 = arith.addf %31, %32 : vector<8x32xf32>
    %34 = arith.truncf %33 : vector<8x32xf32> to vector<8x32xbf16>
    %c0_9 = arith.constant 0 : index
    %c0_10 = arith.constant 0 : index
    %c0_11 = arith.constant 0 : index
    %35 = vector.load %arg3[%c0_9, %c0_10, %c0_11] : memref<1x32x96xbf16, #tpu.memory_space<vmem>>, vector<1x32x96xbf16>
    %36 = vector.shape_cast %35 : vector<1x32x96xbf16> to vector<32x96xbf16>
    %cst_12 = arith.constant dense<0.000000e+00> : vector<8x96xf32>
    %37 = tpu.matmul %34, %36, %cst_12 {dimension_numbers = #tpu.dot_dimension_numbers<[1], [0], [0], [1], [0, 0, 1, 1], [], []>} : vector<8x32xbf16>, vector<32x96xbf16>, vector<8x96xf32> -> vector<8x96xf32>
    %38 = vector.broadcast %8 : vector<1x96xf32> to vector<8x96xf32>
    %39 = arith.addf %37, %38 : vector<8x96xf32>
    %cst_13 = arith.constant 0.000000e+00 : f32
    %40 = vector.broadcast %cst_13 : f32 to vector<8x32xf32>
    %41 = vector.extract_strided_slice %39 {offsets = [0, 0], sizes = [8, 8], strides = [1, 1]} : vector<8x96xf32> to vector<8x8xf32>
    %42 = vector.extract_strided_slice %39 {offsets = [0, 32], sizes = [8, 8], strides = [1, 1]} : vector<8x96xf32> to vector<8x8xf32>
    %43 = vector.extract_strided_slice %39 {offsets = [0, 64], sizes = [8, 8], strides = [1, 1]} : vector<8x96xf32> to vector<8x8xf32>
    %44 = arith.truncf %41 : vector<8x8xf32> to vector<8x8xbf16>
    %45 = arith.truncf %42 : vector<8x8xf32> to vector<8x8xbf16>
    %cst_14 = arith.constant dense<0.000000e+00> : vector<8x8xf32>
    %46 = tpu.matmul %44, %45, %cst_14 {dimension_numbers = #tpu.dot_dimension_numbers<[1], [1], [0], [0], [0, 0, 1, 0], [], []>} : vector<8x8xbf16>, vector<8x8xbf16>, vector<8x8xf32> -> vector<8x8xf32>
    %cst_15 = arith.constant 0.353553385 : f32
    %47 = vector.broadcast %cst_15 : f32 to vector<8x8xf32>
    %48 = arith.mulf %46, %47 : vector<8x8xf32>
    %cst_16 = arith.constant dense<0xFF800000> : vector<8xf32>
    %49 = vector.multi_reduction <maximumf>, %48, %cst_16 [1] : vector<8x8xf32> to vector<8xf32>
    %50 = vector.shape_cast %49 : vector<8xf32> to vector<8x1xf32>
    %51 = vector.broadcast %50 : vector<8x1xf32> to vector<8x8xf32>
    %52 = arith.subf %48, %51 : vector<8x8xf32>
    %53 = math.exp %52 : vector<8x8xf32>
    %cst_17 = arith.constant dense<0.000000e+00> : vector<8xf32>
    %54 = vector.multi_reduction <add>, %53, %cst_17 [1] : vector<8x8xf32> to vector<8xf32>
    %55 = vector.shape_cast %54 : vector<8xf32> to vector<8x1xf32>
    %56 = vector.broadcast %55 : vector<8x1xf32> to vector<8x8xf32>
    %57 = arith.divf %53, %56 : vector<8x8xf32>
    %58 = arith.truncf %57 : vector<8x8xf32> to vector<8x8xbf16>
    %59 = arith.truncf %43 : vector<8x8xf32> to vector<8x8xbf16>
    %cst_18 = arith.constant dense<0.000000e+00> : vector<8x8xf32>
    %60 = tpu.matmul %58, %59, %cst_18 {dimension_numbers = #tpu.dot_dimension_numbers<[1], [0], [0], [1], [0, 0, 1, 1], [], []>} : vector<8x8xbf16>, vector<8x8xbf16>, vector<8x8xf32> -> vector<8x8xf32>
    %61 = arith.truncf %60 : vector<8x8xf32> to vector<8x8xbf16>
    %c0_19 = arith.constant 0 : index
    %c0_20 = arith.constant 0 : index
    %c0_21 = arith.constant 0 : index
    %c0_22 = arith.constant 0 : index
    %62 = vector.load %arg4[%c0_19, %c0_20, %c0_21, %c0_22] : memref<1x4x8x32xbf16, #tpu.memory_space<vmem>>, vector<1x1x8x32xbf16>
    %63 = vector.shape_cast %62 : vector<1x1x8x32xbf16> to vector<8x32xbf16>
    %cst_23 = arith.constant dense<0.000000e+00> : vector<8x32xf32>
    %64 = tpu.matmul %61, %63, %cst_23 {dimension_numbers = #tpu.dot_dimension_numbers<[1], [0], [0], [1], [0, 0, 1, 1], [], []>} : vector<8x8xbf16>, vector<8x32xbf16>, vector<8x32xf32> -> vector<8x32xf32>
    %65 = arith.addf %40, %64 : vector<8x32xf32>
    %66 = vector.extract_strided_slice %39 {offsets = [0, 8], sizes = [8, 8], strides = [1, 1]} : vector<8x96xf32> to vector<8x8xf32>
    %67 = vector.extract_strided_slice %39 {offsets = [0, 40], sizes = [8, 8], strides = [1, 1]} : vector<8x96xf32> to vector<8x8xf32>
    %68 = vector.extract_strided_slice %39 {offsets = [0, 72], sizes = [8, 8], strides = [1, 1]} : vector<8x96xf32> to vector<8x8xf32>
    %69 = arith.truncf %66 : vector<8x8xf32> to vector<8x8xbf16>
    %70 = arith.truncf %67 : vector<8x8xf32> to vector<8x8xbf16>
    %cst_24 = arith.constant dense<0.000000e+00> : vector<8x8xf32>
    %71 = tpu.matmul %69, %70, %cst_24 {dimension_numbers = #tpu.dot_dimension_numbers<[1], [1], [0], [0], [0, 0, 1, 0], [], []>} : vector<8x8xbf16>, vector<8x8xbf16>, vector<8x8xf32> -> vector<8x8xf32>
    %cst_25 = arith.constant 0.353553385 : f32
    %72 = vector.broadcast %cst_25 : f32 to vector<8x8xf32>
    %73 = arith.mulf %71, %72 : vector<8x8xf32>
    %cst_26 = arith.constant dense<0xFF800000> : vector<8xf32>
    %74 = vector.multi_reduction <maximumf>, %73, %cst_26 [1] : vector<8x8xf32> to vector<8xf32>
    %75 = vector.shape_cast %74 : vector<8xf32> to vector<8x1xf32>
    %76 = vector.broadcast %75 : vector<8x1xf32> to vector<8x8xf32>
    %77 = arith.subf %73, %76 : vector<8x8xf32>
    %78 = math.exp %77 : vector<8x8xf32>
    %cst_27 = arith.constant dense<0.000000e+00> : vector<8xf32>
    %79 = vector.multi_reduction <add>, %78, %cst_27 [1] : vector<8x8xf32> to vector<8xf32>
    %80 = vector.shape_cast %79 : vector<8xf32> to vector<8x1xf32>
    %81 = vector.broadcast %80 : vector<8x1xf32> to vector<8x8xf32>
    %82 = arith.divf %78, %81 : vector<8x8xf32>
    %83 = arith.truncf %82 : vector<8x8xf32> to vector<8x8xbf16>
    %84 = arith.truncf %68 : vector<8x8xf32> to vector<8x8xbf16>
    %cst_28 = arith.constant dense<0.000000e+00> : vector<8x8xf32>
    %85 = tpu.matmul %83, %84, %cst_28 {dimension_numbers = #tpu.dot_dimension_numbers<[1], [0], [0], [1], [0, 0, 1, 1], [], []>} : vector<8x8xbf16>, vector<8x8xbf16>, vector<8x8xf32> -> vector<8x8xf32>
    %86 = arith.truncf %85 : vector<8x8xf32> to vector<8x8xbf16>
    %c0_29 = arith.constant 0 : index
    %c1 = arith.constant 1 : index
    %c0_30 = arith.constant 0 : index
    %c0_31 = arith.constant 0 : index
    %87 = vector.load %arg4[%c0_29, %c1, %c0_30, %c0_31] : memref<1x4x8x32xbf16, #tpu.memory_space<vmem>>, vector<1x1x8x32xbf16>
    %88 = vector.shape_cast %87 : vector<1x1x8x32xbf16> to vector<8x32xbf16>
    %cst_32 = arith.constant dense<0.000000e+00> : vector<8x32xf32>
    %89 = tpu.matmul %86, %88, %cst_32 {dimension_numbers = #tpu.dot_dimension_numbers<[1], [0], [0], [1], [0, 0, 1, 1], [], []>} : vector<8x8xbf16>, vector<8x32xbf16>, vector<8x32xf32> -> vector<8x32xf32>
    %90 = arith.addf %65, %89 : vector<8x32xf32>
    %91 = vector.extract_strided_slice %39 {offsets = [0, 16], sizes = [8, 8], strides = [1, 1]} : vector<8x96xf32> to vector<8x8xf32>
    %92 = vector.extract_strided_slice %39 {offsets = [0, 48], sizes = [8, 8], strides = [1, 1]} : vector<8x96xf32> to vector<8x8xf32>
    %93 = vector.extract_strided_slice %39 {offsets = [0, 80], sizes = [8, 8], strides = [1, 1]} : vector<8x96xf32> to vector<8x8xf32>
    %94 = arith.truncf %91 : vector<8x8xf32> to vector<8x8xbf16>
    %95 = arith.truncf %92 : vector<8x8xf32> to vector<8x8xbf16>
    %cst_33 = arith.constant dense<0.000000e+00> : vector<8x8xf32>
    %96 = tpu.matmul %94, %95, %cst_33 {dimension_numbers = #tpu.dot_dimension_numbers<[1], [1], [0], [0], [0, 0, 1, 0], [], []>} : vector<8x8xbf16>, vector<8x8xbf16>, vector<8x8xf32> -> vector<8x8xf32>
    %cst_34 = arith.constant 0.353553385 : f32
    %97 = vector.broadcast %cst_34 : f32 to vector<8x8xf32>
    %98 = arith.mulf %96, %97 : vector<8x8xf32>
    %cst_35 = arith.constant dense<0xFF800000> : vector<8xf32>
    %99 = vector.multi_reduction <maximumf>, %98, %cst_35 [1] : vector<8x8xf32> to vector<8xf32>
    %100 = vector.shape_cast %99 : vector<8xf32> to vector<8x1xf32>
    %101 = vector.broadcast %100 : vector<8x1xf32> to vector<8x8xf32>
    %102 = arith.subf %98, %101 : vector<8x8xf32>
    %103 = math.exp %102 : vector<8x8xf32>
    %cst_36 = arith.constant dense<0.000000e+00> : vector<8xf32>
    %104 = vector.multi_reduction <add>, %103, %cst_36 [1] : vector<8x8xf32> to vector<8xf32>
    %105 = vector.shape_cast %104 : vector<8xf32> to vector<8x1xf32>
    %106 = vector.broadcast %105 : vector<8x1xf32> to vector<8x8xf32>
    %107 = arith.divf %103, %106 : vector<8x8xf32>
    %108 = arith.truncf %107 : vector<8x8xf32> to vector<8x8xbf16>
    %109 = arith.truncf %93 : vector<8x8xf32> to vector<8x8xbf16>
    %cst_37 = arith.constant dense<0.000000e+00> : vector<8x8xf32>
    %110 = tpu.matmul %108, %109, %cst_37 {dimension_numbers = #tpu.dot_dimension_numbers<[1], [0], [0], [1], [0, 0, 1, 1], [], []>} : vector<8x8xbf16>, vector<8x8xbf16>, vector<8x8xf32> -> vector<8x8xf32>
    %111 = arith.truncf %110 : vector<8x8xf32> to vector<8x8xbf16>
    %c0_38 = arith.constant 0 : index
    %c2 = arith.constant 2 : index
    %c0_39 = arith.constant 0 : index
    %c0_40 = arith.constant 0 : index
    %112 = vector.load %arg4[%c0_38, %c2, %c0_39, %c0_40] : memref<1x4x8x32xbf16, #tpu.memory_space<vmem>>, vector<1x1x8x32xbf16>
    %113 = vector.shape_cast %112 : vector<1x1x8x32xbf16> to vector<8x32xbf16>
    %cst_41 = arith.constant dense<0.000000e+00> : vector<8x32xf32>
    %114 = tpu.matmul %111, %113, %cst_41 {dimension_numbers = #tpu.dot_dimension_numbers<[1], [0], [0], [1], [0, 0, 1, 1], [], []>} : vector<8x8xbf16>, vector<8x32xbf16>, vector<8x32xf32> -> vector<8x32xf32>
    %115 = arith.addf %90, %114 : vector<8x32xf32>
    %116 = vector.extract_strided_slice %39 {offsets = [0, 24], sizes = [8, 8], strides = [1, 1]} : vector<8x96xf32> to vector<8x8xf32>
    %117 = vector.extract_strided_slice %39 {offsets = [0, 56], sizes = [8, 8], strides = [1, 1]} : vector<8x96xf32> to vector<8x8xf32>
    %118 = vector.extract_strided_slice %39 {offsets = [0, 88], sizes = [8, 8], strides = [1, 1]} : vector<8x96xf32> to vector<8x8xf32>
    %119 = arith.truncf %116 : vector<8x8xf32> to vector<8x8xbf16>
    %120 = arith.truncf %117 : vector<8x8xf32> to vector<8x8xbf16>
    %cst_42 = arith.constant dense<0.000000e+00> : vector<8x8xf32>
    %121 = tpu.matmul %119, %120, %cst_42 {dimension_numbers = #tpu.dot_dimension_numbers<[1], [1], [0], [0], [0, 0, 1, 0], [], []>} : vector<8x8xbf16>, vector<8x8xbf16>, vector<8x8xf32> -> vector<8x8xf32>
    %cst_43 = arith.constant 0.353553385 : f32
    %122 = vector.broadcast %cst_43 : f32 to vector<8x8xf32>
    %123 = arith.mulf %121, %122 : vector<8x8xf32>
    %cst_44 = arith.constant dense<0xFF800000> : vector<8xf32>
    %124 = vector.multi_reduction <maximumf>, %123, %cst_44 [1] : vector<8x8xf32> to vector<8xf32>
    %125 = vector.shape_cast %124 : vector<8xf32> to vector<8x1xf32>
    %126 = vector.broadcast %125 : vector<8x1xf32> to vector<8x8xf32>
    %127 = arith.subf %123, %126 : vector<8x8xf32>
    %128 = math.exp %127 : vector<8x8xf32>
    %cst_45 = arith.constant dense<0.000000e+00> : vector<8xf32>
    %129 = vector.multi_reduction <add>, %128, %cst_45 [1] : vector<8x8xf32> to vector<8xf32>
    %130 = vector.shape_cast %129 : vector<8xf32> to vector<8x1xf32>
    %131 = vector.broadcast %130 : vector<8x1xf32> to vector<8x8xf32>
    %132 = arith.divf %128, %131 : vector<8x8xf32>
    %133 = arith.truncf %132 : vector<8x8xf32> to vector<8x8xbf16>
    %134 = arith.truncf %118 : vector<8x8xf32> to vector<8x8xbf16>
    %cst_46 = arith.constant dense<0.000000e+00> : vector<8x8xf32>
    %135 = tpu.matmul %133, %134, %cst_46 {dimension_numbers = #tpu.dot_dimension_numbers<[1], [0], [0], [1], [0, 0, 1, 1], [], []>} : vector<8x8xbf16>, vector<8x8xbf16>, vector<8x8xf32> -> vector<8x8xf32>
    %136 = arith.truncf %135 : vector<8x8xf32> to vector<8x8xbf16>
    %c0_47 = arith.constant 0 : index
    %c3 = arith.constant 3 : index
    %c0_48 = arith.constant 0 : index
    %c0_49 = arith.constant 0 : index
    %137 = vector.load %arg4[%c0_47, %c3, %c0_48, %c0_49] : memref<1x4x8x32xbf16, #tpu.memory_space<vmem>>, vector<1x1x8x32xbf16>
    %138 = vector.shape_cast %137 : vector<1x1x8x32xbf16> to vector<8x32xbf16>
    %cst_50 = arith.constant dense<0.000000e+00> : vector<8x32xf32>
    %139 = tpu.matmul %136, %138, %cst_50 {dimension_numbers = #tpu.dot_dimension_numbers<[1], [0], [0], [1], [0, 0, 1, 1], [], []>} : vector<8x8xbf16>, vector<8x32xbf16>, vector<8x32xf32> -> vector<8x32xf32>
    %140 = arith.addf %115, %139 : vector<8x32xf32>
    %141 = arith.addf %3, %140 : vector<8x32xf32>
    %142 = vector.broadcast %9 : vector<1x32xf32> to vector<8x32xf32>
    %143 = arith.addf %141, %142 : vector<8x32xf32>
    %cst_51 = arith.constant dense<0.000000e+00> : vector<8xf32>
    %144 = vector.multi_reduction <add>, %143, %cst_51 [1] : vector<8x32xf32> to vector<8xf32>
    %145 = vector.shape_cast %144 : vector<8xf32> to vector<8x1xf32>
    %cst_52 = arith.constant 3.200000e+01 : f32
    %146 = vector.broadcast %cst_52 : f32 to vector<8x1xf32>
    %147 = arith.divf %145, %146 : vector<8x1xf32>
    %148 = vector.broadcast %147 : vector<8x1xf32> to vector<8x32xf32>
    %149 = arith.subf %143, %148 : vector<8x32xf32>
    %150 = arith.mulf %149, %149 : vector<8x32xf32>
    %cst_53 = arith.constant dense<0.000000e+00> : vector<8xf32>
    %151 = vector.multi_reduction <add>, %150, %cst_53 [1] : vector<8x32xf32> to vector<8xf32>
    %152 = vector.shape_cast %151 : vector<8xf32> to vector<8x1xf32>
    %cst_54 = arith.constant 3.200000e+01 : f32
    %153 = vector.broadcast %cst_54 : f32 to vector<8x1xf32>
    %154 = arith.divf %152, %153 : vector<8x1xf32>
    %cst_55 = arith.constant 9.99999997E-7 : f32
    %155 = vector.broadcast %cst_55 : f32 to vector<8x1xf32>
    %156 = arith.addf %154, %155 : vector<8x1xf32>
    %157 = math.rsqrt %156 : vector<8x1xf32>
    %158 = vector.broadcast %157 : vector<8x1xf32> to vector<8x32xf32>
    %159 = arith.mulf %149, %158 : vector<8x32xf32>
    %160 = vector.broadcast %10 : vector<1x32xf32> to vector<8x32xf32>
    %161 = arith.mulf %159, %160 : vector<8x32xf32>
    %162 = vector.broadcast %11 : vector<1x32xf32> to vector<8x32xf32>
    %163 = arith.addf %161, %162 : vector<8x32xf32>
    %164 = arith.truncf %163 : vector<8x32xf32> to vector<8x32xbf16>
    %c0_56 = arith.constant 0 : index
    %c0_57 = arith.constant 0 : index
    %c0_58 = arith.constant 0 : index
    %165 = vector.load %arg5[%c0_56, %c0_57, %c0_58] : memref<1x32x64xbf16, #tpu.memory_space<vmem>>, vector<1x32x64xbf16>
    %166 = vector.shape_cast %165 : vector<1x32x64xbf16> to vector<32x64xbf16>
    %cst_59 = arith.constant dense<0.000000e+00> : vector<8x64xf32>
    %167 = tpu.matmul %164, %166, %cst_59 {dimension_numbers = #tpu.dot_dimension_numbers<[1], [0], [0], [1], [0, 0, 1, 1], [], []>} : vector<8x32xbf16>, vector<32x64xbf16>, vector<8x64xf32> -> vector<8x64xf32>
    %168 = vector.broadcast %12 : vector<1x64xf32> to vector<8x64xf32>
    %169 = arith.addf %167, %168 : vector<8x64xf32>
    %170 = arith.mulf %169, %169 : vector<8x64xf32>
    %171 = arith.mulf %169, %170 : vector<8x64xf32>
    %cst_60 = arith.constant 4.471500e-02 : f32
    %172 = vector.broadcast %cst_60 : f32 to vector<8x64xf32>
    %173 = arith.mulf %172, %171 : vector<8x64xf32>
    %174 = arith.addf %169, %173 : vector<8x64xf32>
    %cst_61 = arith.constant 0.797884583 : f32
    %175 = vector.broadcast %cst_61 : f32 to vector<8x64xf32>
    %176 = arith.mulf %175, %174 : vector<8x64xf32>
    %177 = math.tanh %176 : vector<8x64xf32>
    %cst_62 = arith.constant 1.000000e+00 : f32
    %178 = vector.broadcast %cst_62 : f32 to vector<8x64xf32>
    %179 = arith.addf %178, %177 : vector<8x64xf32>
    %cst_63 = arith.constant 5.000000e-01 : f32
    %180 = vector.broadcast %cst_63 : f32 to vector<8x64xf32>
    %181 = arith.mulf %180, %179 : vector<8x64xf32>
    %182 = arith.mulf %169, %181 : vector<8x64xf32>
    %183 = arith.truncf %182 : vector<8x64xf32> to vector<8x64xbf16>
    %c0_64 = arith.constant 0 : index
    %c0_65 = arith.constant 0 : index
    %c0_66 = arith.constant 0 : index
    %184 = vector.load %arg6[%c0_64, %c0_65, %c0_66] : memref<1x64x32xbf16, #tpu.memory_space<vmem>>, vector<1x64x32xbf16>
    %185 = vector.shape_cast %184 : vector<1x64x32xbf16> to vector<64x32xbf16>
    %cst_67 = arith.constant dense<0.000000e+00> : vector<8x32xf32>
    %186 = tpu.matmul %183, %185, %cst_67 {dimension_numbers = #tpu.dot_dimension_numbers<[1], [0], [0], [1], [0, 0, 1, 1], [], []>} : vector<8x64xbf16>, vector<64x32xbf16>, vector<8x32xf32> -> vector<8x32xf32>
    %187 = vector.broadcast %13 : vector<1x32xf32> to vector<8x32xf32>
    %188 = arith.addf %186, %187 : vector<8x32xf32>
    %189 = arith.addf %143, %188 : vector<8x32xf32>
    %c0_68 = arith.constant 0 : index
    %c0_69 = arith.constant 0 : index
    %190 = vector.load %arg8[%c0_68, %c0_69] : memref<8x32xf32, #tpu.memory_space<vmem>>, vector<8x32xf32>
    tpu.vector_store %arg8[%c0_68, %c0_69], %189 {strides = array<i32>} : memref<8x32xf32, #tpu.memory_space<vmem>>, vector<8x32xf32>,
    return
  }
  func.func @transform_0(%arg0: i32, %arg1: i32) -> (i32, i32) {
    %c0_i32 = arith.constant 0 : i32
    %c0_i32_0 = arith.constant 0 : i32
    return %arg0, %c0_i32 : i32, i32
  }
  func.func @transform_1(%arg0: i32, %arg1: i32) -> (i32, i32, i32) {
    %c0_i32 = arith.constant 0 : i32
    %c0_i32_0 = arith.constant 0 : i32
    %c0_i32_1 = arith.constant 0 : i32
    return %arg1, %c0_i32, %c0_i32_0 : i32, i32, i32
  }
  func.func @transform_2(%arg0: i32, %arg1: i32) -> (i32, i32, i32, i32) {
    %c0_i32 = arith.constant 0 : i32
    %c0_i32_0 = arith.constant 0 : i32
    %c0_i32_1 = arith.constant 0 : i32
    %c0_i32_2 = arith.constant 0 : i32
    return %arg1, %c0_i32, %c0_i32_0, %c0_i32_1 : i32, i32, i32, i32
  }
  func.func @transform_3(%arg0: i32, %arg1: i32) -> (i32, i32, i32) {
    %c0_i32 = arith.constant 0 : i32
    %c0_i32_0 = arith.constant 0 : i32
    %c0_i32_1 = arith.constant 0 : i32
    return %arg1, %c0_i32, %c0_i32_0 : i32, i32, i32
  }
  func.func @transform_4(%arg0: i32, %arg1: i32) -> (i32, i32, i32) {
    %c0_i32 = arith.constant 0 : i32
    %c0_i32_0 = arith.constant 0 : i32
    %c0_i32_1 = arith.constant 0 : i32
    return %arg1, %c0_i32, %c0_i32_0 : i32, i32, i32
  }
  func.func @transform_5(%arg0: i32, %arg1: i32) -> (i32, i32, i32) {
    %c0_i32 = arith.constant 0 : i32
    %c0_i32_0 = arith.constant 0 : i32
    %c0_i32_1 = arith.constant 0 : i32
    return %arg1, %c0_i32, %c0_i32_0 : i32, i32, i32
  }
  func.func @transform_6(%arg0: i32, %arg1: i32) -> (i32, i32) {
    %c0_i32 = arith.constant 0 : i32
    %c0_i32_0 = arith.constant 0 : i32
    return %arg0, %c0_i32 : i32, i32
  }
}

</mosaic_0001>

<bundles_post_ra>
// kernel: tpu_custom_call.1
= control target key start
LH: loop header
LB: loop body
LE: loop exit
PB: predicated region body
PF: predicated region fallthrough
CT: control target
= control target key end

     0   :  { %s2316_s0 = inlined_call_operand.hbm [shape: f32[16,32], index: 0, kind: input, shape index: {}]   ;;  %s2317_s1 = inlined_call_operand.vmem [shape: bf16[2,32,96], index: 1, kind: input, shape index: {}]   ;;  %s2318_s2 = inlined_call_operand.vmem [shape: bf16[2,4,8,32], index: 2, kind: input, shape index: {}]   ;;  %s2319_s3 = inlined_call_operand.vmem [shape: bf16[2,32,64], index: 3, kind: input, shape index: {}]   ;;  %s2320_s4 = inlined_call_operand.vmem [shape: bf16[2,64,32], index: 4, kind: input, shape index: {}]   ;;  %s2321_s5 = inlined_call_operand.vmem [shape: f32[2,8,128], index: 5, kind: input, shape index: {}]   ;;  %s2322_s6 = inlined_call_operand.hbm [shape: f32[16,32], index: 6, kind: output, shape index: {}]  }
   0x1   :  { %2331 = sst [smem:[#allocation17_spill]] %s2316_s0 }
   0x2   :  { %11 = vsyncpa [#allocation3], 0 }
   0x3   :  { %13 = vsyncpa [#allocation3 + $0x1], 0 }
   0x4   :  { %14 = vsyncpa [#allocation4], 0 }
   0x5   :  { %16 = vsyncpa [#allocation4 + $0x1], 0  ;;  %s1947_s21 = smov 0   ;;  %s1949_s22 = smov 0  }
   0x6   :  { %s1951_s23 = smov 0   ;;  %s1953_s24 = smov 0  }
   0x7   :  { %s1955_s25 = smov 0   ;;  %s1957_s26 = smov 0  }
   0x8   :  { %s1959_s27 = smov 0   ;;  %s1961_s28 = smov 0  }
   0x9 LB: > { %2332 = sst [smem:[#allocation8_spill]] %s1867_s21  ;;  %s1458_s29 = sadd.s32 4294967295, %s1895_s28   ;;  %s1895_s28 = sphi %s1961_s28, %s22_s28   ;;  %s1891_s27 = sphi %s1959_s27, %s2359_s27   ;;  %s1887_s26 = sphi %s1957_s26, %s2358_s26   ;;  %s1883_s25 = sphi %s1955_s25, %s2357_s25   ;;  %s1879_s24 = sphi %s1953_s24, %s2356_s24   ;;  %s1875_s23 = sphi %s1951_s23, %s2355_s23   ;;  %s1871_s22 = sphi %s1949_s22, %s2354_s22   ;;  %s1867_s21 = sphi %s1947_s21, %s2353_s21  }
   0xa   : > { %2333 = sst [smem:[#allocation9_spill]] %s1871_s22  ;;  %s1459_s30 = sadd.s32 4294967294, %s1895_s28  }
   0xb   : > { %2334 = sst [smem:[#allocation10_spill]] %s1875_s23  ;;  %s31_s7 = sadd.s32 1, %s1887_s26 }
   0xc   : > { %2335 = sst [smem:[#allocation11_spill]] %s1887_s26  ;;  %s34_s8 = sadd.s32 1, %s1891_s27 }
   0xd   : > { %2336 = sst [smem:[#allocation12_spill]] %s1891_s27  ;;  %p32_p0 = scmp.ge.s32.totalorder %s31_s7, 2 }
   0xe   : > { %s41_s9 = sadd.s32 1, %s1875_s23  ;;  %p48_p1 = scmp.ne.s32.totalorder %s1875_s23, %s1871_s22 }
   0xf   : > { %p49_p2 = scmp.eq.s32.totalorder %s1895_s28, 0  ;;  %s2361_s7 = smov (%p32_p0, %s31_s7), 0 }
  0x10   : > { %2337 = sst [smem:[#allocation13_spill]] %s2361_s7  ;;  %s2363_s8 = smov (!%p32_p0, %s34_s8), %s1891_s27 }
  0x11   : > { %p1998_p3 = por %p49_p2, %p48_p1  ;;  %p54_p4 = scmp.ne.s32.totalorder %s1871_s22, %s1867_s21 }
  0x12   : > { %p36_p5 = scmp.ge.s32.totalorder %s2363_s8, 2  ;;  %p55_p6 = scmp.eq.s32.totalorder %s1458_s29, 0 }
  0x13   : > { %p208_p7 = scmp.eq.s32.totalorder %s1458_s29, 3  ;;  %p214_p8 = scmp.eq.s32.totalorder %s1459_s30, 3 }
  0x14   : > { %s2365_s8 = smov (%p36_p5, %s2363_s8), 0  ;;  %p2006_p9 = por %p55_p6, %p54_p4 }
  0x15   : > { %2339 = sst [smem:[#allocation14_spill]] %s2365_s8  ;;  %p2010_p10 = por %p208_p7, %p48_p1 }
  0x16   : > { %s38_s13 = ssub.s32 %s1891_s27, %s2365_s8  ;;  %p2016_p11 = por %p214_p8, %p54_p4 }
  0x17   : > { %s2341_s12 = scalar_select %p2010_p10, 1, 0 }
  0x18   : > { %s2342_s14 = scalar_select %p2016_p11, 1, 0 }
  0x19   : > { %p39_p12 = scmp.eq.s32.totalorder %s38_s13, 0  ;;  %p1658_p13 = scmp.lt.s32.totalorder %s1895_s28, 4 }
  0x1a   : > { %2343 = sst [smem:[#allocation15_spill]] %s2342_s14  ;;  %s234_s15 = sand.u32 1, %s1875_s23  }
  0x1b   : > { %s2023_s16 = scalar_select %p39_p12, %s1875_s23, %s41_s9  }
  0x1c   : > { %s1462_s17 = sshll.u32 %s234_s15, 3  ;;  %s1463_s18 = sshll.u32 %s1891_s27, 7 }
  0x1d   : > { %2344 = sst [smem:[#allocation16_spill]] %s2023_s16  ;;  %s2345_s0 = sld [smem:[#allocation17_spill]] }
  0x1e   : > { %s238_s30 = scalar_lea.vmem [#allocation2], %s1462_s17  ;;  %p2035_p0 = pnand %p1658_p13, %p1998_p3 }
  0x1f   : > { %s245_s8 = sshll.u32 %s238_s30, 4  ;;  %s235_s9 = scalar_lea.sflag [#allocation3], %s234_s15  ;;  %s2031_s8 = int_to_ptr.vmem [resolvable:$true] %s245_s8 }
  0x20   : > { %p1769_p5 = pneg %p2035_p0 }
  0x23   : > { %s2029_s29 = scalar_lea.hbm %s2345_s0, %s1463_s18  ;;  %s1772_s10 = scalar_lea.hbm %s2345_s0, 256 }
  0x24   : > { %s1767_s18 = scalar_lea.hbm %s2029_s29, 128  ;;  %p1773_p3 = scmp.lt.u32.totalorder %s2029_s29, %s2345_s0 }
  0x25   : > { %p1768_p4 = scmp.ne.s32.totalorder %s2029_s29, %s1767_s18  ;;  %p1774_p8 = scmp.lt.u32.totalorder %s1772_s10, %s1767_s18 }
  0x26   : > { %p1776_p13 = scmp.lt.u32.totalorder %s1767_s18, %s2029_s29 }
  0x27   : > { %p1770_p6 = pnand %p1769_p5, %p1768_p4  ;;  %p1775_p12 = por %p1774_p8, %p1773_p3 }
  0x29   : > { %p1771_p7 = pneg %p1770_p6  ;;  %p1777_p1 = por %p1776_p13, %p1775_p12 }
  0x2b   : > { %p1778_p2 = pnand %p1777_p1, %p1771_p7 }
  0x2d   : > { %1781 = shalt.err (!%p1778_p2)
}
  0x2e   : > { %s1782_s15 = scalar_lea.vmem %s2031_s8, 128  ;;  %s1897_s17 = smov [#allocation2]  }
  0x2f   : > { %p1783_p4 = scmp.ne.s32.totalorder %s2031_s8, %s1782_s15  ;;  %s1787_s19 = sshll.u32 %s1897_s17, 4  ;;  %s1788_s19 = int_to_ptr.vmem [resolvable:$false] %s1787_s19 }
  0x30   : > { %s1789_s20 = scalar_lea.vmem %s1788_s19, 256  ;;  %p1790_p10 = scmp.lt.s32.totalorder %s2031_s8, %s1788_s19 }
  0x31   : > { %p1785_p6 = pnand %p1783_p4, %p1769_p5  ;;  %p1791_p3 = scmp.lt.s32.totalorder %s1789_s20, %s1782_s15 }
  0x33   : > { %p1786_p11 = pneg %p1785_p6  ;;  %p1792_p8 = por %p1791_p3, %p1790_p10 }
  0x35   : > { %p1793_p12 = pnand %p1792_p8, %p1786_p11 }
  0x37   : > { %1796 = shalt.err (!%p1793_p12)
}
  0x38   : > { %1653 = dma.hbm_to_vmem [thread:$0]  (!%p2035_p0), %s2029_s29, 128, %s2031_s8, %s235_s9  }
  0x39   : > { %p2347_p1 = scmp.lt.s32.totalorder %s1895_s28, 5  ;;  %p2348_p2 = scmp.ge.s32.totalorder %s1895_s28, 1 }
  0x3b   : > { %p290_p5 = pnand %p2348_p2, %p2347_p1 }
  0x3c   : > { %s2071_s18 = sand.u32 (!%p290_p5), 1, %s1871_s22  }
  0x3d   : > { %293 = sbr.rel (%p290_p5) target bundleno = 3784 (0xec8), region = 44  ;;  %s1465_s10 = sshll.u32 (!%p290_p5), %s2071_s18, 3 }
  0x3e   : > { %s296_s30 = scalar_lea.sflag (!%p290_p5), [#allocation3], %s2071_s18  ;;  %s299_s15 = scalar_lea.vmem (!%p290_p5), [#allocation2], %s1465_s10 }
  0x44   : > { %1858 = dma.done.wait (%p2006_p9), %s296_s30, 128  }
  0x45   : > { %1860 = vsyncadd (%p2006_p9), %s296_s30, 4294967168  ;;  %p352_p10 = scmp.lt.s32.totalorder %s1879_s24, 1  ;;  %s2104_s17 = scalar_lea.vmem [#allocation5], %s1465_s10 }
  0x46   : > { %p1476_p9 = scmp.ne.s32.totalorder %s1879_s24, 0 }
  0x47   : > { %s353_s8 = scalar_select %p352_p10, %s1879_s24, 1 }
  0x48   : > { %380 = sbr.rel (%p1476_p9) target bundleno = 79 (0x4f), region = 52  ;;  %v381_v0 = vld [vmem:[%s299_s15] sm:$0xff] (!%p1476_p9)  ;;  %vm382_vm0 = vcmask (!%p1476_p9), 261120  }
  0x49   : > { %s1507_s29 = sshll.u32 %s353_s8, 4  ;;  %s1510_s13 = sshll.u32 %s353_s8, 5  ;;  %383 = vst.msk [vmem:[%s2104_s17] sm:$0xff] (!%p1476_p9), %vm382_vm0, %v381_v0 }
  0x4a   : > { %s356_s19 = scalar_lea.vmem %s2317_s1, %s1507_s29  ;;  %s2087_s7 = scalar_lea.vmem %s2318_s2, %s1507_s29 }
  0x4b   : > { %s2092_s11 = scalar_lea.vmem %s2319_s3, %s1507_s29  ;;  %s2097_s23 = scalar_lea.vmem %s2320_s4, %s1510_s13 }
  0x4c   : > { %s1475_s22 = sshll.u32 %s353_s8, 3 }
  0x4d   : > { %s2102_s9 = scalar_lea.vmem %s2321_s5, %s1475_s22 }
  0x4f PF: > { %vm386_vm1 = vcmask 261120   ;;  %v1737_v8 = vld [vmem:[%s356_s19] sm:$0xff]   ;;  %v1898_v9 = vmov 0.0   ;;  %vm1899_vm2 = vmmov 0   ;;  %v1738_v10 = vld [vmem:[%s356_s19 + $0x8] sm:$0xff]   ;;  %v401_v13 = vlaneseq  ;;  %s1900_s0 = smov 120  }
  0x50   : > { %v2109_v1 = vld [vmem:[%s2104_s17] sm:$0xff]  ;;  %1546 = vmatprep.subr.bf16.mxu1 %v1898_v9  ;;  %1550 = vmatprep.mubr.msk.bf16.mxu1 %vm1899_vm2, %v1898_v9  ;;  %v2127_v17 = vld [vmem:[%s2102_s9] sm:$0xff]  ;;  %s1901_s21 = smov 96   ;;  %s1902_s22 = smov 88   ;;  %vm479_vm3 = vcmask 64512   ;;  %vm544_vm4 = vcmask 1043456  }
  0x51   : > { %v387_v2 = vsel %vm386_vm1, %v2109_v1, 0.0  ;;  %1547 = vmatpush3.bf16.msra.mxu1 %v1737_v8  ;;  %1560 = vmatprep.subr.bf16.mxu0 %v1898_v9  ;;  %v2123_v15 = vshrl.u32 %v401_v13, 7  ;;  %s1903_s24 = smov 56   ;;  %s1904_s26 = smov 64   ;;  %v1484_v13 = vld [vmem:[%s2087_s7 + $0x4] sm:$0xf] }
  0x52   : > { %388 = vadd.xlane.f32.xlu0 %v387_v2  ;;  %1548 = vmatprep.subr.bf16.mxu1 %v1898_v9  ;;  %s1905_s27 = smov 80   ;;  %s1906_s14 = smov 112   ;;  %vm1257_vm5 = vcmask 523264  }
  0x53   : > { %1562 = vmatprep.mubr.msk.bf16.mxu0 %vm1899_vm2, %v1898_v9  ;;  %v403_v16 = vsub.s32 0, %v2123_v15  ;;  %v408_v18 = vsub.s32 1, %v2123_v15  ;;  %v418_v26 = vsub.s32 2, %v2123_v15  ;;  %s1907_s16 = smov 48   ;;  %s1908_s10 = smov 104  }
  0x54   : > { %s1909_s15 = smov 72   ;;  %s1910_s8 = smov 40  }
  0x55   : > { %1549 = vmatpush3.bf16.msra.mxu1 %v1738_v10  ;;  %v404_v19 = vrot.slane %v2127_v17, %v403_v16  ;;  %v409_v22 = vrot.slane %v2127_v17, %v408_v18  ;;  %v419_v27 = vrot.slane %v2127_v17, %v418_v26  ;;  %p2349_p0 = scmp.ne.s32.totalorder %s2341_s12, 0 }
  0x56   : > { %1554 = vmatprep.subr.bf16.mxu1 %v1898_v9 }
  0xdf   : > { %v389_v3 = vpop.xlane.xlu0 %388 }
  0xe0   : > { %v391_v4 = vmul.f32 0.03125, %v389_v3 }
  0xe2   : > { %v392_v5 = vsub.f32 %v2109_v1, %v391_v4 }
  0xe4   : > { %v393_v6 = vmul.f32 %v392_v5, %v392_v5 }
  0xe6   : > { %v394_v7 = vsel %vm386_vm1, %v393_v6, 0.0 }
  0xe7   : > { %395 = vadd.xlane.f32.xlu0 %v394_v7 }
 0x174   : > { %v396_v11 = vpop.xlane.xlu0 %395 }
 0x175   : > { %v397_v12 = vmul.f32 0.03125, %v396_v11  ;;  %v589_v11 = vld [vmem:[%s2087_s7] sm:$0xf] }
 0x177   : > { %v398_v14 = vadd.f32 1e-06, %v397_v12  ;;  %v754_v12 = vsel %vm544_vm4, %v589_v11, 0 }
 0x179   : > { %1745 = vrsqrt.f32 %v398_v14  ;;  %v708_v14 = vsel %vm544_vm4, %v1484_v13, 0 }
 0x183   : > { %v1746_v20 = vpop.eup %1745 }
 0x184   : > { %v400_v21 = vmul.f32 %v1746_v20, %v392_v5 }
 0x186   : > { %v405_v23 = vmul.f32 %v404_v19, %v400_v21 }
 0x188   : > { %v410_v24 = vadd.f32 %v409_v22, %v405_v23 }
 0x18a   : > { %v411_v25 = vpack.c.bf16 %v410_v24, %v410_v24 }
 0x18c   : > { %1551 = vmatmul.mubr.msk.bf16.vlgmr.msra.gmra.mrb[0].mxu1 %vm386_vm1, %v411_v25 }
 0x18d   : > { %1556 = vmatprep.mubr.msk.bf16.mxu1 %vm1899_vm2, %v1898_v9 }
 0x25f   : > { %v469_v28 = vpop.f32.mrb[0].mxu1 }
 0x260   : > { %v470_v29 = vadd.f32 %v469_v28, %v419_v27  ;;  %v1552_v30 = vpop.f32.mrb[1].mxu1 }
 0x261   : > { %v472_v31 = vpop.f32.mrb[2].mxu1 }
 0x262   : > { %v2137_v32 = vpack.c.bf16 %v470_v29, %v470_v29  ;;  %v1553_v33 = vpop.f32.mrb[3].mxu1 }
 0x264   : > { %590 = vrot.lane.b32.xlu0 %v2137_v32, %s1900_s0  ;;  %477 = vrot.lane.b32.xlu1 %v2137_v32, %s1901_s21 }
 0x268   : > { %592 = vrot.lane.b32.xlu1 %v2137_v32, %s1902_s22 }
 0x2d6   : > { %v478_v34 = vpop.permute.xlu1 %477  ;;  %v591_v38 = vpop.permute.xlu0 %590 }
 0x2d7   : > { %v484_v35 = vsel %vm479_vm3, %v478_v34, 0 }
 0x2d8   : > { %1555 = vmatpush3.bf16.xpose.msra.mxu1 %v484_v35 }
 0x2d9   : > { %1566 = vmatprep.subr.bf16.mxu1 %v1898_v9 }
 0x2da   : > { %v593_v36 = vpop.permute.xlu1 %592 }
 0x2db   : > { %v598_v37 = vsel %vm479_vm3, %v593_v36, 0 }
 0x2df   : > { %1557 = vmatmul.mubr.msk.bf16.vlgmr.msra.gmra.mrb[4].mxu1 %vm479_vm3, %v2137_v32 }
 0x2e0   : > { %1567 = vmatpush3.bf16.xpose.msra.mxu1 %v598_v37  ;;  %1568 = vmatprep.mubr.msk.bf16.mxu1 %vm1899_vm2, %v1898_v9 }
 0x2e1   : > { %1578 = vmatprep.subr.bf16.mxu1 %v1898_v9 }
 0x2e7   : > { %1569 = vmatmul.mubr.msk.bf16.vlgmr.msra.gmra.mrb[8].mxu1 %vm479_vm3, %v591_v38 }
 0x2e8   : > { %1580 = vmatprep.mubr.msk.bf16.mxu1 %vm1899_vm2, %v1898_v9  ;;  %1579 = vmatpush3.bf16.msra.mxu1 %v708_v14 }
 0x2e9   : > { %1590 = vmatprep.subr.bf16.mxu1 %v1898_v9 }
 0x3b2   : > { %v520_v39 = vpop.f32.mrb[4].mxu1 }
 0x3b3   : > { %v526_v40 = vmul.f32 0.35355338, %v520_v39  ;;  %v1558_v41 = vpop.f32.mrb[5].mxu1 }
 0x3b4   : > { %v523_v42 = vpop.f32.mrb[6].mxu1 }
 0x3b5   : > { %v1559_v43 = vpop.f32.mrb[7].mxu1  ;;  %v527_v44 = vsel %vm479_vm3, %v526_v40, -inf }
 0x3b6   : > { %528 = vmax.xlane.f32.xlu1 %v527_v44 }
 0x3ba   : > { %v634_v45 = vpop.f32.mrb[8].mxu1 }
 0x3bb   : > { %v640_v46 = vmul.f32 0.35355338, %v634_v45  ;;  %v1570_v47 = vpop.f32.mrb[9].mxu1 }
 0x3bc   : > { %v637_v48 = vpop.f32.mrb[10].mxu1 }
 0x3bd   : > { %v1571_v49 = vpop.f32.mrb[11].mxu1  ;;  %v641_v50 = vsel %vm479_vm3, %v640_v46, -inf }
 0x3be   : > { %642 = vmax.xlane.f32.xlu0 %v641_v50 }
 0x3d4   : > { %653 = vrot.lane.b32.xlu0 %v2137_v32, %s1903_s24 }
 0x443   : > { %v529_v51 = vpop.xlane.xlu1 %528 }
 0x444   : > { %v530_v52 = vsub.f32 %v526_v40, %v529_v51 }
 0x446   : > { %v531_v53 = vmul.f32 1.442695, %v530_v52 }
 0x448   : > { %1747 = vpow2.f32 %v531_v53 }
 0x44b   : > { %v643_v54 = vpop.xlane.xlu0 %642 }
 0x44c   : > { %v644_v55 = vsub.f32 %v640_v46, %v643_v54 }
 0x44e   : > { %v645_v56 = vmul.f32 1.442695, %v644_v55 }
 0x44f   : > { %v654_v4 = vpop.permute.xlu0 %653 }
 0x450   : > { %1749 = vpow2.f32 %v645_v56  ;;  %v659_v6 = vsel %vm544_vm4, %v654_v4, 0 }
 0x452   : > { %v1748_v57 = vpop.eup %1747 }
 0x453   : > { %v533_v58 = vsel %vm479_vm3, %v1748_v57, 0.0 }
 0x454   : > { %534 = vadd.xlane.f32.xlu1 %v533_v58 }
 0x45a   : > { %v1750_v59 = vpop.eup %1749 }
 0x45b   : > { %v647_v60 = vsel %vm479_vm3, %v1750_v59, 0.0 }
 0x45c   : > { %648 = vadd.xlane.f32.xlu1 %v647_v60  ;;  %v1489_v60 = vld [vmem:[%s2087_s7 + $0x8] sm:$0xf] }
 0x46d   : > { %539 = vrot.lane.b32.xlu1 %v2137_v32, %s1904_s26 }
 0x471   : > { %798 = vrot.lane.b32.xlu1 %v2137_v32, %s1905_s27 }
 0x475   : > { %796 = vrot.lane.b32.xlu1 %v2137_v32, %s1906_s14 }
 0x4e1   : > { %v535_v61 = vpop.xlane.xlu1 %534 }
 0x4e2   : > { %1751 = vrcp.f32 %v535_v61  ;;  %v914_v61 = vsel %vm544_vm4, %v1489_v60, 0 }
 0x4e9   : > { %v649_v62 = vpop.xlane.xlu1 %648 }
 0x4ea   : > { %1753 = vrcp.f32 %v649_v62 }
 0x4ec   : > { %v1752_v63 = vpop.eup %1751 }
 0x4ed   : > { %v540_v0 = vpop.permute.xlu1 %539  ;;  %v537_v2 = vmul.f32 %v1752_v63, %v1748_v57 }
 0x4ee   : > { %v546_v3 = vsel %vm544_vm4, %v540_v0, 0 }
 0x4ef   : > { %1561 = vmatpush3.bf16.msra.mxu0 %v546_v3  ;;  %v538_v5 = vpack.c.bf16 %v537_v2, %v537_v2 }
 0x4f0   : > { %1572 = vmatprep.subr.bf16.mxu0 %v1898_v9 }
 0x4f1   : > { %v799_v22 = vpop.permute.xlu1 %798 }
 0x4f2   : > { %1563 = vmatmul.mubr.msk.bf16.vlgmr.msra.gmra.mrb[0].mxu0 %vm479_vm3, %v538_v5  ;;  %v804_v27 = vsel %vm479_vm3, %v799_v22, 0 }
 0x4f3   : > { %1573 = vmatpush3.bf16.msra.mxu0 %v659_v6  ;;  %1574 = vmatprep.mubr.msk.bf16.mxu0 %vm1899_vm2, %v1898_v9 }
 0x4f4   : > { %v1754_v7 = vpop.eup %1753  ;;  %1584 = vmatprep.subr.bf16.mxu0 %v1898_v9 }
 0x4f5   : > { %v651_v8 = vmul.f32 %v1754_v7, %v1750_v59  ;;  %v797_v29 = vpop.permute.xlu1 %796 }
 0x4f7   : > { %v652_v10 = vpack.c.bf16 %v651_v8, %v651_v8 }
 0x4fa   : > { %1575 = vmatmul.mubr.msk.bf16.vlgmr.msra.gmra.mrb[4].mxu0 %vm479_vm3, %v652_v10 }
 0x4fb   : > { %1586 = vmatprep.mubr.msk.bf16.mxu0 %vm1899_vm2, %v1898_v9  ;;  %1585 = vmatpush3.bf16.msra.mxu0 %v754_v12 }
 0x4fc   : > { %1596 = vmatprep.subr.bf16.mxu0 %v1898_v9 }
 0x5c5   : > { %v582_v16 = vpop.f32.mrb[0].mxu0 }
 0x5c6   : > { %v588_v18 = vpack.c.bf16 %v582_v16, %v582_v16  ;;  %v1564_v19 = vpop.f32.mrb[1].mxu0 }
 0x5c7   : > { %v585_v20 = vpop.f32.mrb[2].mxu0 }
 0x5c8   : > { %v1565_v21 = vpop.f32.mrb[3].mxu0  ;;  %1587 = vmatmul.mubr.msk.bf16.vlgmr.msra.gmra.mrb[8].mxu0 %vm479_vm3, %v588_v18  ;;  %v1493_v18 = vld [vmem:[%s2087_s7 + $0xc] sm:$0xf]  ;;  %s1317_s7 = sshll.u32 %s2104_s17, 4  ;;  %s2262_s7 = int_to_ptr.vmem [resolvable:$true] %s1317_s7 }
 0x5c9   : > { %1598 = vmatprep.mubr.msk.bf16.mxu0 %vm1899_vm2, %v1898_v9  ;;  %v1075_v19 = vsel %vm544_vm4, %v1493_v18, 0  ;;  %s1797_s20 = scalar_lea.vmem %s2262_s7, 128 }
 0x5ca   : > { %p1798_p11 = scmp.ne.s32.totalorder %s2262_s7, %s1797_s20 }
 0x5cc   : > { %p1799_p7 = pnand %p1798_p11, %p2349_p0 }
 0x5cd   : > { %v695_v23 = vpop.f32.mrb[4].mxu0 }
 0x5ce   : > { %v701_v24 = vpack.c.bf16 %v695_v23, %v695_v23  ;;  %v1576_v25 = vpop.f32.mrb[5].mxu0  ;;  %p1800_p13 = pneg %p1799_p7 }
 0x5cf   : > { %v698_v26 = vpop.f32.mrb[6].mxu0 }
 0x5d0   : > { %v1577_v28 = vpop.f32.mrb[7].mxu0  ;;  %1581 = vmatmul.mubr.msk.bf16.vlgmr.msra.gmra.mrb[12].mxu1 %vm479_vm3, %v701_v24 }
 0x5d1   : > { %1591 = vmatpush3.bf16.xpose.msra.mxu1 %v804_v27  ;;  %1592 = vmatprep.mubr.msk.bf16.mxu1 %vm1899_vm2, %v1898_v9 }
 0x5d2   : > { %1602 = vmatprep.subr.bf16.mxu1 %v1898_v9 }
 0x5d8   : > { %1593 = vmatmul.mubr.msk.bf16.vlgmr.msra.gmra.mrb[16].mxu1 %vm479_vm3, %v797_v29 }
 0x5d9   : > { %1604 = vmatprep.mubr.msk.bf16.mxu1 %vm1899_vm2, %v1898_v9  ;;  %1603 = vmatpush3.bf16.msra.mxu1 %v914_v61 }
 0x5da   : > { %1614 = vmatprep.subr.bf16.mxu1 %v1898_v9 }
 0x69b   : > { %v790_v30 = vpop.f32.mrb[8].mxu0 }
 0x69c   : > { %v1588_v31 = vpop.f32.mrb[9].mxu0 }
 0x69d   : > { %v793_v33 = vpop.f32.mrb[10].mxu0 }
 0x69e   : > { %v1589_v34 = vpop.f32.mrb[11].mxu0 }
 0x6a3   : > { %v744_v35 = vpop.f32.mrb[12].mxu1 }
 0x6a4   : > { %v2188_v36 = vadd.f32 %v790_v30, %v744_v35  ;;  %v1582_v37 = vpop.f32.mrb[13].mxu1 }
 0x6a5   : > { %v747_v38 = vpop.f32.mrb[14].mxu1 }
 0x6a6   : > { %v1583_v39 = vpop.f32.mrb[15].mxu1 }
 0x6ab   : > { %v840_v40 = vpop.f32.mrb[16].mxu1 }
 0x6ac   : > { %v846_v41 = vmul.f32 0.35355338, %v840_v40  ;;  %v1594_v42 = vpop.f32.mrb[17].mxu1 }
 0x6ad   : > { %v843_v43 = vpop.f32.mrb[18].mxu1 }
 0x6ae   : > { %v1595_v44 = vpop.f32.mrb[19].mxu1  ;;  %v847_v45 = vsel %vm479_vm3, %v846_v41, -inf }
 0x6af   : > { %848 = vmax.xlane.f32.xlu1 %v847_v45 }
 0x6c0   : > { %859 = vrot.lane.b32.xlu1 %v2137_v32, %s1907_s16 }
 0x6c4   : > { %957 = vrot.lane.b32.xlu1 %v2137_v32, %s1908_s10 }
 0x73c   : > { %v849_v46 = vpop.xlane.xlu1 %848 }
 0x73d   : > { %v850_v47 = vsub.f32 %v846_v41, %v849_v46 }
 0x73f   : > { %v851_v48 = vmul.f32 1.442695, %v850_v47 }
 0x740   : > { %v860_v49 = vpop.permute.xlu1 %859 }
 0x741   : > { %1755 = vpow2.f32 %v851_v48  ;;  %v865_v50 = vsel %vm544_vm4, %v860_v49, 0 }
 0x742   : > { %1597 = vmatpush3.bf16.msra.mxu0 %v865_v50 }
 0x743   : > { %1608 = vmatprep.subr.bf16.mxu0 %v1898_v9 }
 0x744   : > { %v958_v59 = vpop.permute.xlu1 %957 }
 0x74b   : > { %v1756_v51 = vpop.eup %1755 }
 0x74c   : > { %v853_v52 = vsel %vm479_vm3, %v1756_v51, 0.0 }
 0x74d   : > { %854 = vadd.xlane.f32.xlu0 %v853_v52  ;;  %v1740_v52 = vld [vmem:[%s2092_s11 + $0x8] sm:$0xff]  }
 0x763   : > { %959 = vrot.lane.b32.xlu0 %v2137_v32, %s1909_s15 }
 0x7da   : > { %v855_v53 = vpop.xlane.xlu0 %854 }
 0x7db   : > { %1757 = vrcp.f32 %v855_v53 }
 0x7de   : > { %v960_v56 = vpop.permute.xlu0 %959 }
 0x7df   : > { %v965_v58 = vsel %vm479_vm3, %v960_v56, 0  ;;  %v1144_v56 = vsub.s32 5, %v2123_v15 }
 0x7e1   : > { %v1145_v60 = vrot.slane %v2127_v17, %v1144_v56 }
 0x7e5   : > { %v1758_v54 = vpop.eup %1757 }
 0x7e6   : > { %v857_v55 = vmul.f32 %v1758_v54, %v1756_v51  ;;  %v1739_v51 = vld [vmem:[%s2092_s11] sm:$0xff]   ;;  %s1911_s11 = smov [#allocation5]  }
 0x7e7   : > { %s1801_s30 = sshll.u32 %s1911_s11, 4  ;;  %s1802_s30 = int_to_ptr.vmem [resolvable:$false] %s1801_s30 }
 0x7e8   : > { %v858_v57 = vpack.c.bf16 %v857_v55, %v857_v55  ;;  %v1139_v55 = vsub.s32 4, %v2123_v15  ;;  %s1803_s9 = scalar_lea.vmem %s1802_s30, 256  ;;  %p1804_p4 = scmp.lt.s32.totalorder %s2262_s7, %s1802_s30 }
 0x7e9   : > { %p1805_p6 = scmp.lt.s32.totalorder %s1803_s9, %s1797_s20 }
 0x7ea   : > { %1599 = vmatmul.mubr.msk.bf16.vlgmr.msra.gmra.mrb[12].mxu0 %vm479_vm3, %v858_v57  ;;  %v1140_v57 = vrot.slane %v2127_v17, %v1139_v55 }
 0x7eb   : > { %1609 = vmatpush3.bf16.xpose.msra.mxu0 %v965_v58  ;;  %1610 = vmatprep.mubr.msk.bf16.mxu0 %vm1899_vm2, %v1898_v9  ;;  %p1806_p3 = por %p1805_p6, %p1804_p4 }
 0x7ec   : > { %1620 = vmatprep.subr.bf16.mxu0 %v1898_v9 }
 0x7ed   : > { %p1807_p8 = pnand %p1806_p3, %p1800_p13 }
 0x7f2   : > { %1611 = vmatmul.mubr.msk.bf16.vlgmr.msra.gmra.mrb[16].mxu0 %vm479_vm3, %v958_v59 }
 0x7f3   : > { %1622 = vmatprep.mubr.msk.bf16.mxu0 %vm1899_vm2, %v1898_v9  ;;  %1621 = vmatpush3.bf16.msra.mxu0 %v1075_v19 }
 0x7f4   : > { %1634 = vmatprep.subr.bf16.mxu0 %v1898_v9 }
 0x8bd   : > { %v901_v62 = vpop.f32.mrb[12].mxu0 }
 0x8be   : > { %v907_v63 = vpack.c.bf16 %v901_v62, %v901_v62  ;;  %v1600_v0 = vpop.f32.mrb[13].mxu0 }
 0x8bf   : > { %v904_v2 = vpop.f32.mrb[14].mxu0  ;;  %v1741_v0 = vld [vmem:[%s2097_s23] sm:$0xff]  }
 0x8c0   : > { %v1601_v3 = vpop.f32.mrb[15].mxu0  ;;  %1605 = vmatmul.mubr.msk.bf16.vlgmr.msra.gmra.mrb[20].mxu1 %vm479_vm3, %v907_v63  ;;  %v1742_v2 = vld [vmem:[%s2097_s23 + $0x8] sm:$0xff]  }
 0x8c1   : > { %1616 = vmatprep.mubr.msk.bf16.mxu1 %vm1899_vm2, %v1898_v9  ;;  %v1743_v3 = vld [vmem:[%s2097_s23 + $0x10] sm:$0xff]  }
 0x8c5   : > { %v1001_v4 = vpop.f32.mrb[16].mxu0 }
 0x8c6   : > { %v1007_v5 = vmul.f32 0.35355338, %v1001_v4  ;;  %v1612_v6 = vpop.f32.mrb[17].mxu0  ;;  %v1744_v4 = vld [vmem:[%s2097_s23 + $0x18] sm:$0xff]   ;;  %s1504_s23 = sshll.u32 %s1883_s25, 7  ;;  %s1304_s25 = scalar_lea.sflag [#allocation4], %s2071_s18 }
 0x8c7   : > { %v1004_v7 = vpop.f32.mrb[18].mxu0  ;;  %s2260_s19 = scalar_lea.hbm %s2322_s6, %s1504_s23 }
 0x8c8   : > { %v1613_v8 = vpop.f32.mrb[19].mxu0  ;;  %v1008_v10 = vsel %vm479_vm3, %v1007_v5, -inf }
 0x8c9   : > { %1009 = vmax.xlane.f32.xlu1 %v1008_v10 }
 0x956   : > { %v1010_v11 = vpop.xlane.xlu1 %1009 }
 0x957   : > { %v1011_v12 = vsub.f32 %v1007_v5, %v1010_v11  ;;  %v1154_v5 = vsub.s32 6, %v2123_v15 }
 0x959   : > { %v1012_v13 = vmul.f32 1.442695, %v1011_v12  ;;  %v1155_v6 = vrot.slane %v2127_v17, %v1154_v5 }
 0x95b   : > { %1759 = vpow2.f32 %v1012_v13 }
 0x965   : > { %v1760_v14 = vpop.eup %1759 }
 0x966   : > { %v1014_v16 = vsel %vm479_vm3, %v1760_v14, 0.0 }
 0x967   : > { %1015 = vadd.xlane.f32.xlu0 %v1014_v16 }
 0x97d   : > { %1020 = vrot.lane.b32.xlu0 %v2137_v32, %s1910_s8 }
 0x993   : > { %v950_v20 = vpop.f32.mrb[20].mxu1 }
 0x994   : > { %v956_v21 = vadd.f32 %v950_v20, %v2188_v36  ;;  %v1606_v22 = vpop.f32.mrb[21].mxu1  ;;  %v1121_v36 = vsub.s32 3, %v2123_v15 }
 0x995   : > { %v953_v23 = vpop.f32.mrb[22].mxu1 }
 0x996   : > { %v1607_v24 = vpop.f32.mrb[23].mxu1  ;;  %v1122_v39 = vrot.slane %v2127_v17, %v1121_v36 }
 0x997   : > { %v1231_v24 = vsub.s32 7, %v2123_v15 }
 0x9f4   : > { %v1016_v25 = vpop.xlane.xlu0 %1015 }
 0x9f5   : > { %1761 = vrcp.f32 %v1016_v25  ;;  %v1232_v25 = vrot.slane %v2127_v17, %v1231_v24 }
 0x9f8   : > { %v1021_v26 = vpop.permute.xlu0 %1020 }
 0x9f9   : > { %v1026_v27 = vsel %vm544_vm4, %v1021_v26, 0 }
 0x9fa   : > { %1615 = vmatpush3.bf16.msra.mxu1 %v1026_v27 }
 0x9fb   : > { %1626 = vmatprep.subr.bf16.mxu1 %v1898_v9 }
 0x9ff   : > { %v1762_v32 = vpop.eup %1761 }
 0xa00   : > { %v1018_v28 = vmul.f32 %v1762_v32, %v1760_v14 }
 0xa02   : > { %v1019_v29 = vpack.c.bf16 %v1018_v28, %v1018_v28 }
 0xa04   : > { %1617 = vmatmul.mubr.msk.bf16.vlgmr.msra.gmra.mrb[24].mxu1 %vm479_vm3, %v1019_v29 }
 0xa05   : > { %1630 = vmatprep.mubr.msk.bf16.mxu1 %vm1899_vm2, %v1898_v9  ;;  %1627 = vmatpush3.bf16.msra.mxu1 %v1739_v51 }
 0xa06   : > { %1628 = vmatprep.subr.bf16.mxu1 %v1898_v9 }
 0xa09   : > { %1629 = vmatpush3.bf16.msra.mxu1 %v1740_v52 }
 0xad7   : > { %v1062_v30 = vpop.f32.mrb[24].mxu1 }
 0xad8   : > { %v1068_v31 = vpack.c.bf16 %v1062_v30, %v1062_v30  ;;  %v1618_v33 = vpop.f32.mrb[25].mxu1 }
 0xad9   : > { %v1065_v34 = vpop.f32.mrb[26].mxu1 }
 0xada   : > { %v1619_v35 = vpop.f32.mrb[27].mxu1  ;;  %1623 = vmatmul.mubr.msk.bf16.vlgmr.msra.gmra.mrb[20].mxu0 %vm479_vm3, %v1068_v31 }
 0xadb   : > { %1642 = vmatprep.mubr.msk.bf16.mxu0 %vm1899_vm2, %v1898_v9  ;;  %1635 = vmatpush3.bf16.msra.mxu0 %v1741_v0 }
 0xadc   : > { %1636 = vmatprep.subr.bf16.mxu0 %v1898_v9 }
 0xadf   : > { %1637 = vmatpush3.bf16.msra.mxu0 %v1742_v2 }
 0xae0   : > { %1638 = vmatprep.subr.bf16.mxu0 %v1898_v9 }
 0xae3   : > { %1639 = vmatpush3.bf16.msra.mxu0 %v1743_v3 }
 0xae4   : > { %1640 = vmatprep.subr.bf16.mxu0 %v1898_v9 }
 0xae7   : > { %1641 = vmatpush3.bf16.msra.mxu0 %v1744_v4 }
 0xbad   : > { %v1111_v37 = vpop.f32.mrb[20].mxu0 }
 0xbae   : > { %v1117_v38 = vadd.f32 %v1111_v37, %v956_v21  ;;  %v1624_v40 = vpop.f32.mrb[21].mxu0 }
 0xbaf   : > { %v1114_v41 = vpop.f32.mrb[22].mxu0 }
 0xbb0   : > { %v1118_v42 = vadd.f32 %v1117_v38, %v2109_v1  ;;  %v1625_v43 = vpop.f32.mrb[23].mxu0 }
 0xbb2   : > { %v2229_v44 = vadd.f32 %v1122_v39, %v1118_v42 }
 0xbb4   : > { %v1124_v45 = vsel %vm386_vm1, %v2229_v44, 0.0 }
 0xbb5   : > { %1125 = vadd.xlane.f32.xlu1 %v1124_v45 }
 0xc42   : > { %v1126_v46 = vpop.xlane.xlu1 %1125 }
 0xc43   : > { %v1127_v47 = vmul.f32 0.03125, %v1126_v46 }
 0xc45   : > { %v1128_v48 = vsub.f32 %v2229_v44, %v1127_v47 }
 0xc47   : > { %v1129_v49 = vmul.f32 %v1128_v48, %v1128_v48 }
 0xc49   : > { %v1130_v50 = vsel %vm386_vm1, %v1129_v49, 0.0 }
 0xc4a   : > { %1131 = vadd.xlane.f32.xlu1 %v1130_v50 }
 0xcd7   : > { %v1132_v1 = vpop.xlane.xlu1 %1131 }
 0xcd8   : > { %v1133_v53 = vmul.f32 0.03125, %v1132_v1 }
 0xcda   : > { %v1134_v54 = vadd.f32 1e-06, %v1133_v53 }
 0xcdc   : > { %1763 = vrsqrt.f32 %v1134_v54 }
 0xce6   : > { %v1764_v58 = vpop.eup %1763 }
 0xce7   : > { %v1136_v59 = vmul.f32 %v1764_v58, %v1128_v48 }
 0xce9   : > { %v1141_v61 = vmul.f32 %v1140_v57, %v1136_v59 }
 0xceb   : > { %v1146_v62 = vadd.f32 %v1145_v60, %v1141_v61 }
 0xced   : > { %v1147_v63 = vpack.c.bf16 %v1146_v62, %v1146_v62 }
 0xcef   : > { %1631 = vmatmul.mubr.msk.bf16.vlgmr.msra.gmra.mrb[28].mxu1 %vm386_vm1, %v1147_v63 }
 0xdc2   : > { %v1205_v7 = vpop.f32.mrb[28].mxu1 }
 0xdc3   : > { %v1206_v8 = vadd.f32 %v1205_v7, %v1155_v6  ;;  %v1632_v10 = vpop.f32.mrb[29].mxu1 }
 0xdc4   : > { %v1208_v11 = vpop.f32.mrb[30].mxu1 }
 0xdc5   : > { %v1211_v12 = vmul.f32 %v1206_v8, %v1206_v8  ;;  %v1633_v13 = vpop.f32.mrb[31].mxu1 }
 0xdc7   : > { %v1212_v14 = vmul.f32 %v1211_v12, %v1206_v8 }
 0xdc9   : > { %v1213_v16 = vmul.f32 0.044715, %v1212_v14 }
 0xdcb   : > { %v1214_v18 = vadd.f32 %v1213_v16, %v1206_v8 }
 0xdcd   : > { %v1215_v19 = vmul.f32 0.7978846, %v1214_v18 }
 0xdcf   : > { %1765 = vtanh.f32 %v1215_v19 }
 0xdd9   : > { %v1766_v9 = vpop.eup %1765 }
 0xdda   : > { %v1217_v20 = vadd.f32 1.0, %v1766_v9 }
 0xddc   : > { %v1218_v21 = vmul.f32 0.5, %v1217_v20 }
 0xdde   : > { %v1219_v22 = vmul.f32 %v1218_v21, %v1206_v8 }
 0xde0   : > { %v1220_v23 = vpack.c.bf16 %v1219_v22, %v1219_v22 }
 0xde2   : > { %1643 = vmatmul.mubr.msk.bf16.vlgmr.msra.gmra.mrb[24].mxu0 %vm1257_vm5, %v1220_v23 }
 0xeb5   : > { %v1295_v26 = vpop.f32.mrb[24].mxu0 }
 0xeb6   : > { %v1296_v27 = vadd.f32 %v1295_v26, %v1232_v25  ;;  %v1644_v32 = vpop.f32.mrb[25].mxu0 }
 0xeb7   : > { %v1298_v28 = vpop.f32.mrb[26].mxu0 }
 0xeb8   : > { %v1301_v29 = vadd.f32 %v1296_v27, %v2229_v44  ;;  %v1645_v30 = vpop.f32.mrb[27].mxu0 }
 0xeba   : > { %1302 = vst.msk [vmem:[%s2104_s17] sm:$0xff] %vm386_vm1, %v1301_v29 }
 0xebb   : > { %1810 = shalt.err (!%p1807_p8)
}
 0xebc   : > { %s1811_s18 = scalar_lea.hbm %s2260_s19, 128  ;;  %s1815_s21 = scalar_lea.hbm %s2322_s6, 256 }
 0xebd   : > { %p1812_p12 = scmp.ne.s32.totalorder %s2260_s19, %s1811_s18  ;;  %p1816_p5 = scmp.lt.u32.totalorder %s2260_s19, %s2322_s6 }
 0xebe   : > { %p1817_p10 = scmp.lt.u32.totalorder %s1815_s21, %s1811_s18  ;;  %p1819_p11 = scmp.lt.u32.totalorder %s1811_s18, %s2260_s19 }
 0xebf   : > { %p1813_p1 = pnand %p1812_p12, %p2349_p0 }
 0xec0   : > { %p1818_p9 = por %p1817_p10, %p1816_p5 }
 0xec1   : > { %p1814_p2 = pneg %p1813_p1 }
 0xec2   : > { %p1820_p7 = por %p1819_p11, %p1818_p9 }
 0xec4   : > { %p1821_p13 = pnand %p1820_p7, %p1814_p2 }
 0xec6   : > { %1824 = shalt.err (!%p1821_p13)
}
 0xec7   : > { %1648 = dma.vmem_to_hbm [thread:$0]  (%p2349_p0), %s2262_s7, 128, %s2260_s19, %s1304_s25  }
 0xec8 PF: > { %s2350_s26 = sld [smem:[#allocation8_spill]]  ;;  %s2351_s27 = sld [smem:[#allocation15_spill]] }
 0xec9   : > { %p1659_p4 = scmp.ge.s32.totalorder %s1895_s28, 2 }
 0xece   : > { %s1329_s14 = sand.u32 1, %s2350_s26   ;;  %p2352_p6 = scmp.ne.s32.totalorder %s2351_s27, 0 }
 0xecf   : > { %s1330_s16 = scalar_lea.sflag [#allocation4], %s1329_s14 }
 0xed0   : > { %p1655_p3 = pnand %p1659_p4, %p2352_p6 }
 0xed2   : > { %1862 = dma.done.wait (!%p1655_p3), %s1330_s16, 128  }
 0xed3   : > { %1864 = vsyncadd (!%p1655_p3), %s1330_s16, 4294967168  ;;  %s22_s28 = sadd.s32 1, %s1895_s28   ;;  %s2353_s21 = sld [smem:[#allocation9_spill]] }
 0xed4   : > { %p19_p8 = scmp.ge.s32.totalorder %s22_s28, 6   ;;  %s2354_s22 = sld [smem:[#allocation10_spill]] }
 0xed5   : > { %s2355_s23 = sld [smem:[#allocation16_spill]]  ;;  %s2356_s24 = sld [smem:[#allocation11_spill]] }
 0xed6   : > { %s2357_s25 = sld [smem:[#allocation12_spill]]  ;;  %s2358_s26 = sld [smem:[#allocation13_spill]] }
 0xed7   : > { %s2359_s27 = sld [smem:[#allocation14_spill]]  ;;  %21 = sbr.rel (!%p19_p8) target bundleno = 9 (0x9), region = 111 }
 0xede   :  { %1335 = vsyncpa [#allocation3], 1 }
 0xedf   :  { %1337 = vsyncpa [#allocation3 + $0x1], 1 }
 0xee0   :  { %1338 = vsyncpa [#allocation4], 1 }
 0xee1   :  { %1340 = vsyncpa [#allocation4 + $0x1], 1 }

</bundles_post_ra>
